<compile_context>
chip_gen: v6e
topology: v6e:2x2x1
jax: 0.10.0
libtpu: 0.0.40
codegen_flags: <defaults>
</compile_context>

<pallas_src>
import jax
import jax.numpy as jnp
from jax.experimental import pallas as pl
from jax.experimental.pallas import tpu as pltpu


def _round_up(n, m):
    return ((n + m - 1) // m) * m


def _linear_kernel(x_ref, w_ref, b_ref, o_ref):
    # x_ref: (TILE_B, F) VMEM tile (streamed per grid step; tail rows of a
    #        ragged final block hold garbage and their outputs are clipped)
    # w_ref: (1, F)      VMEM, resident across the grid (constant index_map)
    # b_ref: (1,)        SMEM scalar
    # o_ref: (1, TILE_B) VMEM lane-dense output tile
    x = x_ref[...]                                   # (TILE_B, F)
    w = w_ref[...]                                   # (1, F) -> broadcasts over rows
    # VPU multiply + cross-lane reduce instead of an (F x 1) MXU matmul.
    y = jnp.sum(x * w, axis=-1) + b_ref[0]           # (TILE_B,) f32
    o_ref[...] = y.reshape(1, -1).astype(o_ref.dtype)


def _choose_tile_b(batch, num_features, target_step_bytes):
    """Rows per grid step: fixed lane-padded byte budget of x per step."""
    f_pad = _round_up(num_features, 128)
    bytes_per_row = 4 * f_pad                        # f32, lane-padded width
    tile_b = max(128, (target_step_bytes // bytes_per_row) // 128 * 128)
    # Keep the double-buffered x window comfortably inside v7x's 64 MiB VMEM.
    while tile_b > 128 and 2 * tile_b * bytes_per_row > (32 << 20):
        tile_b = max(128, _round_up(tile_b // 2, 128))
    # Give megacore something to split: aim for >= 4 grid steps on big batches.
    if batch >= 4 * 128:
        tile_b = min(tile_b, max(128, _round_up(-(-batch // 4), 128)))
    # Small batch: one exact block (block dims equal array dims -> always legal).
    if batch <= tile_b:
        tile_b = batch
    return tile_b


def mlpnet_forward(x, weight, bias, *, target_step_bytes=8 * 1024 * 1024):
    """y = x @ weight.T + bias   (PyTorch nn.Linear(F, 1) semantics).

    x: (B, F) float32, weight: (1, F) float32, bias: (1,) float32
    returns: (B, 1) float32
    """
    B, F = x.shape
    assert weight.shape == (1, F)
    assert bias.shape == (1,)

    # TODO(synk): for F < 128, fold features into lanes (reshape x to
    # (B*F//128, 128) with a segmented lane reduce) to avoid 4x lane padding.
    tile_b = _choose_tile_b(B, F, target_step_bytes)
    grid = (pl.cdiv(B, tile_b),)

    # VMEM budget from the lane-padded, double-buffered footprint (+ headroom),
    # clamped to [16 MiB, 48 MiB] so it is legal on every generation.
    f_pad = _round_up(F, 128)
    vmem_needed = (2 * _round_up(tile_b, 8) * f_pad * 4   # x double buffer
                   + 2 * 8 * f_pad * 4                    # weight (sublane-padded)
                   + 2 * 8 * _round_up(tile_b, 128) * 4   # output double buffer
                   + (2 << 20))                           # headroom
    vmem_limit = int(min(48 << 20, max(16 << 20, vmem_needed)))

    out = pl.pallas_call(
        _linear_kernel,
        out_shape=jax.ShapeDtypeStruct((1, B), jnp.float32),
        grid_spec=pltpu.PrefetchScalarGridSpec(
            num_scalar_prefetch=0,
            grid=grid,
            in_specs=[
                pl.BlockSpec((tile_b, F), lambda i: (i, 0)),        # streamed x tiles
                pl.BlockSpec((1, F), lambda i: (0, 0)),             # weight, resident
                pl.BlockSpec(memory_space=pltpu.MemorySpace.SMEM),  # bias scalar
            ],
            out_specs=pl.BlockSpec((1, tile_b), lambda i: (0, i)),  # lane-dense out
        ),
        compiler_params=pltpu.CompilerParams(
            dimension_semantics=("parallel",),   # batch tiles are independent
            vmem_limit_bytes=vmem_limit,
        ),
    )(x, weight, bias)

    return out.reshape(B, 1)


if __name__ == "__main__":
    key = jax.random.PRNGKey(0)
    kx, kw, kb = jax.random.split(key, 3)

    batch = 8
    num_features = 32

    # Deterministic init mirroring torch.nn.Linear's U(-1/sqrt(F), 1/sqrt(F)).
    bound = 1.0 / jnp.sqrt(jnp.float32(num_features))
    weight = jax.random.uniform(kw, (1, num_features), jnp.float32, -bound, bound)
    bias = jax.random.uniform(kb, (1,), jnp.float32, -bound, bound)

    x = jax.random.normal(kx, (batch, num_features), jnp.float32)

    y = mlpnet_forward(x, weight, bias)
    jax.block_until_ready(y)

    # Reference check in plain JAX.
    y_ref = x @ weight.T + bias
    assert y.shape == (batch, 1)
    assert jnp.allclose(y, y_ref, atol=1e-5, rtol=1e-5)

    print("KERNEL_OK")
</pallas_src>

<mosaic_0001>
module attributes {stable_mosaic.version = 11 : i64} {
  func.func @_linear_kernel(%arg0: i32, %arg1: memref<8x32xf32, #tpu.memory_space<vmem>>, %arg2: memref<1x32xf32, #tpu.memory_space<vmem>>, %arg3: memref<1xf32, #tpu.memory_space<smem>>, %arg4: memref<1x8xf32, #tpu.memory_space<vmem>>) attributes {dimension_semantics = [#tpu.dimension_semantics<parallel>], iteration_bounds = array<i64: 1>, scalar_prefetch = 0 : i64, scratch_operands = 0 : i64, tpu.core_type = #tpu.core_type<tc>, window_params = [{transform_indices = @transform_0, window_bounds = array<i64: 8, 32>}, {pipeline_mode = #tpu.pipeline_mode<synchronous>, transform_indices = @transform_1, window_bounds = array<i64: 1, 32>}, {transform_indices = @transform_2, window_bounds = array<i64: 1>}, {transform_indices = @transform_3, window_bounds = array<i64: 1, 8>}]} {
    %c0 = arith.constant 0 : index
    %c0_0 = arith.constant 0 : index
    %0 = vector.load %arg1[%c0, %c0_0] : memref<8x32xf32, #tpu.memory_space<vmem>>, vector<8x32xf32>
    %c0_1 = arith.constant 0 : index
    %c0_2 = arith.constant 0 : index
    %1 = vector.load %arg2[%c0_1, %c0_2] : memref<1x32xf32, #tpu.memory_space<vmem>>, vector<1x32xf32>
    %2 = vector.broadcast %1 : vector<1x32xf32> to vector<8x32xf32>
    %3 = arith.mulf %0, %2 : vector<8x32xf32>
    %cst = arith.constant dense<0.000000e+00> : vector<8xf32>
    %4 = vector.multi_reduction <add>, %3, %cst [1] : vector<8x32xf32> to vector<8xf32>
    %c0_3 = arith.constant 0 : index
    %5 = memref.load %arg3[%c0_3] : memref<1xf32, #tpu.memory_space<smem>>
    %6 = vector.broadcast %5 : f32 to vector<8xf32>
    %7 = arith.addf %4, %6 : vector<8xf32>
    %8 = vector.shape_cast %7 : vector<8xf32> to vector<1x8xf32>
    %c0_4 = arith.constant 0 : index
    %c0_5 = arith.constant 0 : index
    %9 = vector.load %arg4[%c0_4, %c0_5] : memref<1x8xf32, #tpu.memory_space<vmem>>, vector<1x8xf32>
    tpu.vector_store %arg4[%c0_4, %c0_5], %8 {strides = array<i32>} : memref<1x8xf32, #tpu.memory_space<vmem>>, vector<1x8xf32>,
    return
  }
  func.func @transform_0(%arg0: i32) -> (i32, i32) {
    %c0_i32 = arith.constant 0 : i32
    %c0_i32_0 = arith.constant 0 : i32
    return %arg0, %c0_i32 : i32, i32
  }
  func.func @transform_1(%arg0: i32) -> (i32, i32) {
    %c0_i32 = arith.constant 0 : i32
    %c0_i32_0 = arith.constant 0 : i32
    %c0_i32_1 = arith.constant 0 : i32
    return %c0_i32, %c0_i32_0 : i32, i32
  }
  func.func @transform_2(%arg0: i32) -> i32 {
    %c0_i32 = arith.constant 0 : i32
    %c0_i32_0 = arith.constant 0 : i32
    return %c0_i32 : i32
  }
  func.func @transform_3(%arg0: i32) -> (i32, i32) {
    %c0_i32 = arith.constant 0 : i32
    %c0_i32_0 = arith.constant 0 : i32
    return %c0_i32, %arg0 : i32, i32
  }
}

</mosaic_0001>

<bundles_post_ra>
// kernel: tpu_custom_call.1
= control target key start
LH: loop header
LB: loop body
LE: loop exit
PB: predicated region body
PF: predicated region fallthrough
CT: control target
= control target key end

     0   :  { %9 = vsyncpa [#allocation4], 0  ;;  %s150_s0 = inlined_call_operand.hbm [shape: f32[8,32], index: 0, kind: input, shape index: {}]   ;;  %s151_s1 = inlined_call_operand.vmem [shape: f32[1,32], index: 1, kind: input, shape index: {}]   ;;  %s152_s2 = inlined_call_operand.<no memory space> [shape: f32[1], index: 2, kind: input, shape index: {}]   ;;  %s153_s3 = inlined_call_operand.hbm [shape: f32[1,8], index: 3, kind: output, shape index: {}]  }
   0x1   :  { %10 = vsyncpa [#allocation5], 0  ;;  %s116_s12 = smov [#allocation3]  }
   0x2   :  { %s17_s13 = sshll.u32 %s116_s12, 4  ;;  %s18_s13 = int_to_ptr.vmem [resolvable:$true] %s17_s13 }
   0x3   :  { %s80_s14 = scalar_lea.vmem %s18_s13, 128  ;;  %p85_p1 = scmp.lt.s32.totalorder %s18_s13, %s18_s13 }
   0x4   :  { %p81_p0 = scmp.ne.s32.totalorder %s18_s13, %s80_s14  ;;  %p86_p2 = scmp.lt.s32.totalorder %s80_s14, %s80_s14 }
   0x6   :  { %p87_p3 = por %p86_p2, %p85_p1 }
   0x8   :  { %p88_p4 = pnand %p87_p3, %p81_p0 }
   0xa   :  { %91 = shalt.err (!%p88_p4)
}
   0xb   :  { %20 = dma.hbm_to_vmem [thread:$0]  %s150_s0, 128, %s18_s13, [#allocation4]  }
   0xc   :  { %112 = dma.done.wait [#allocation4], 128  }
   0xd   :  { %113 = vsyncadd [#allocation4], 4294967168  ;;  %v28_v0 = vld [vmem:[#allocation3] sm:$0xff]  ;;  %vm37_vm0 = vcmask 261120   ;;  %v45_v4 = vlaneseq  ;;  %v42_v7 = vstv %s152_s2  ;;  %s117_s0 = smov [#allocation6]   ;;  %vm52_vm1 = vcmask 57344  }
   0xe   :  { %v69_v1 = vld [vmem:[%s151_s1] ss:$0 sm:$0xff]  ;;  %s60_s21 = sshll.u32 %s117_s0, 4  ;;  %s61_s21 = int_to_ptr.vmem [resolvable:$true] %s60_s21 }
   0xf   :  { %v36_v2 = vmul.f32 %v69_v1, %v28_v0  ;;  %v46_v5 = vand.u32 127, %v45_v4  ;;  %v48_v6 = vshrl.u32 %v45_v4, 7  ;;  %s92_s1 = scalar_lea.vmem %s61_s21, 16  ;;  %s96_s22 = scalar_lea.vmem %s61_s21, 32 }
  0x10   :  { %p93_p5 = scmp.ne.s32.totalorder %s61_s21, %s92_s1  ;;  %p97_p6 = scmp.lt.s32.totalorder %s61_s21, %s61_s21 }
  0x11   :  { %v38_v3 = vsel %vm37_vm0, %v36_v2, 0.0  ;;  %v49_v8 = vsub.s32 %v46_v5, %v48_v6  ;;  %p98_p7 = scmp.lt.s32.totalorder %s96_s22, %s92_s1 }
  0x12   :  { %39 = vadd.xlane.f32.xlu0 %v38_v3 }
  0x13   :  { %p99_p8 = por %p98_p7, %p97_p6 }
  0x15   :  { %p100_p9 = pnand %p99_p8, %p93_p5 }
  0x9b   :  { %v40_v9 = vpop.xlane.xlu0 %39 }
  0x9c   :  { %v43_v10 = vadd.f32 %v42_v7, %v40_v9 }
  0x9e   :  { %v50_v11 = vrot.slane %v43_v10, %v49_v8 }
  0xa0   :  { %53 = vst.msk [vmem:[#allocation6] sm:$0x1] %vm52_vm1, %v50_v11 }
  0xa1   :  { %103 = shalt.err (!%p100_p9)
}
  0xa2   :  { %63 = dma.vmem_to_hbm [thread:$0]  %s61_s21, 16, %s153_s3, [#allocation5]  }
  0xa3   :  { %114 = dma.done.wait [#allocation5], 16  }
  0xa4   :  { %115 = vsyncadd [#allocation5], 4294967280 }
  0xa5   :  { %67 = vsyncpa [#allocation4], 1 }
  0xa6   :  { %68 = vsyncpa [#allocation5], 1 }

</bundles_post_ra>
